<compile_context>
chip_gen: v7x
topology: tpu7x:2x2x1
jax: 0.10.0
libtpu: 0.0.40
codegen_flags: <defaults>
</compile_context>

<pallas_src>
import functools
import math

import jax
import jax.numpy as jnp
from jax.experimental import pallas as pl
from jax.experimental.pallas import tpu as pltpu


# ---------------------------------------------------------------------------
# Kernel bodies
# ---------------------------------------------------------------------------
def _glu_split_kernel(a_ref, g_ref, o_ref):
    """GLU where the two halves arrive as separate lane-dense blocks."""
    a = a_ref[...].astype(jnp.float32)
    g = g_ref[...].astype(jnp.float32)
    o_ref[...] = (a * jax.nn.sigmoid(g)).astype(o_ref.dtype)


def _glu_fused_last_kernel(x_ref, o_ref, *, half):
    """Fallback (split dim is last, unaligned half): slice halves in-kernel."""
    x = x_ref[...].astype(jnp.float32)
    o_ref[...] = (x[:, :half] * jax.nn.sigmoid(x[:, half:])).astype(o_ref.dtype)


def _glu_fused_mid_kernel(x_ref, o_ref, *, half):
    """Fallback (split dim is a middle dim, unaligned half)."""
    x = x_ref[...].astype(jnp.float32)
    o_ref[...] = (x[:, :half, :] * jax.nn.sigmoid(x[:, half:, :])).astype(o_ref.dtype)


# ---------------------------------------------------------------------------
# Helpers
# ---------------------------------------------------------------------------
def _pick_tile(n, max_tile, align):
    """Largest divisor of n that is <= max_tile and a multiple of `align`.

    Falls back to n itself (full extent is always a legal block size)."""
    for cand in range(min(n, max_tile), 0, -1):
        if n % cand == 0 and cand % align == 0:
            return cand
    return n


def _cost(num_out_elems, itemsize):
    # ~4 VPU flops + 1 transcendental per output element; read 2x + write 1x.
    return pl.CostEstimate(
        flops=4 * num_out_elems,
        transcendentals=num_out_elems,
        bytes_accessed=3 * num_out_elems * itemsize,
    )


# ---------------------------------------------------------------------------
# Wrappers
# ---------------------------------------------------------------------------
def _glu_last_dim(x, half, row_tile):
    """GLU along the last (lane) dimension.  View as (rows, 2*half)."""
    lead = x.shape[:-1]
    rows = math.prod(lead)
    x2 = x.reshape(rows, 2 * half)
    t_rows = _pick_tile(rows, row_tile, align=8)
    grid = (rows // t_rows,)
    itemsize = jnp.dtype(x.dtype).itemsize
    params = pltpu.CompilerParams(dimension_semantics=("parallel",))
    cost = _cost(rows * half, itemsize)

    if half % 128 == 0:
        # Lane-dense fast path: each half is fetched as its own block.
        out = pl.pallas_call(
            _glu_split_kernel,
            out_shape=jax.ShapeDtypeStruct((rows, half), x.dtype),
            grid_spec=pltpu.PrefetchScalarGridSpec(
                num_scalar_prefetch=0,
                grid=grid,
                in_specs=[
                    pl.BlockSpec((t_rows, half), lambda r: (r, 0)),  # outputs half
                    pl.BlockSpec((t_rows, half), lambda r: (r, 1)),  # gate half
                ],
                out_specs=pl.BlockSpec((t_rows, half), lambda r: (r, 0)),
            ),
            compiler_params=params,
            cost_estimate=cost,
        )(x2, x2)
    else:
        # Unaligned channel count: bring the full 2*half block, slice in-kernel.
        out = pl.pallas_call(
            functools.partial(_glu_fused_last_kernel, half=half),
            out_shape=jax.ShapeDtypeStruct((rows, half), x.dtype),
            grid_spec=pltpu.PrefetchScalarGridSpec(
                num_scalar_prefetch=0,
                grid=grid,
                in_specs=[pl.BlockSpec((t_rows, 2 * half), lambda r: (r, 0))],
                out_specs=pl.BlockSpec((t_rows, half), lambda r: (r, 0)),
            ),
            compiler_params=params,
            cost_estimate=cost,
        )(x2)
    return out.reshape(lead + (half,))


def _glu_mid_dim(x, dim, half, inner_tile):
    """GLU along an interior dim.  View as (outer, 2*half, inner) -- no transpose."""
    outer = math.prod(x.shape[:dim])
    inner = math.prod(x.shape[dim + 1:])
    x3 = x.reshape(outer, 2 * half, inner)
    t_inner = _pick_tile(inner, inner_tile, align=128)
    grid = (outer, inner // t_inner)
    itemsize = jnp.dtype(x.dtype).itemsize
    params = pltpu.CompilerParams(dimension_semantics=("parallel", "parallel"))
    cost = _cost(outer * half * inner, itemsize)

    if half % 8 == 0:
        out = pl.pallas_call(
            _glu_split_kernel,
            out_shape=jax.ShapeDtypeStruct((outer, half, inner), x.dtype),
            grid_spec=pltpu.PrefetchScalarGridSpec(
                num_scalar_prefetch=0,
                grid=grid,
                in_specs=[
                    pl.BlockSpec((1, half, t_inner), lambda o, i: (o, 0, i)),  # outputs
                    pl.BlockSpec((1, half, t_inner), lambda o, i: (o, 1, i)),  # gate
                ],
                out_specs=pl.BlockSpec((1, half, t_inner), lambda o, i: (o, 0, i)),
            ),
            compiler_params=params,
            cost_estimate=cost,
        )(x3, x3)
    else:
        out = pl.pallas_call(
            functools.partial(_glu_fused_mid_kernel, half=half),
            out_shape=jax.ShapeDtypeStruct((outer, half, inner), x.dtype),
            grid_spec=pltpu.PrefetchScalarGridSpec(
                num_scalar_prefetch=0,
                grid=grid,
                in_specs=[pl.BlockSpec((1, 2 * half, t_inner), lambda o, i: (o, 0, i))],
                out_specs=pl.BlockSpec((1, half, t_inner), lambda o, i: (o, 0, i)),
            ),
            compiler_params=params,
            cost_estimate=cost,
        )(x3)
    return out.reshape(x.shape[:dim] + (half,) + x.shape[dim + 1:])


def glu(x, dim=-1, *, row_tile=256, inner_tile=512):
    """Forward pass of the PyTorch GLU module: chunk(2, dim) -> a * sigmoid(g)."""
    dim = dim % x.ndim
    size = x.shape[dim]
    assert size % 2 == 0, "GLU split dimension must be even"
    half = size // 2
    if dim == x.ndim - 1:
        return _glu_last_dim(x, half, row_tile)
    return _glu_mid_dim(x, dim, half, inner_tile)


# ---------------------------------------------------------------------------
# Self-test
# ---------------------------------------------------------------------------
if __name__ == "__main__":
    key = jax.random.PRNGKey(0)
    k1, k2 = jax.random.split(key)

    # Case 1: channel-last (B, T, 2C) with C = 128 (lane-dense fast path),
    # GLU along the last dim.  rows = B*T = 1024 -> 4 parallel grid steps.
    B, T, C = 2, 512, 128
    x1 = jax.random.normal(k1, (B, T, 2 * C), dtype=jnp.float32)
    out1 = jax.block_until_ready(glu(x1, dim=-1))
    a1, g1 = jnp.split(x1, 2, axis=-1)
    ref1 = a1 * jax.nn.sigmoid(g1)
    assert out1.shape == ref1.shape
    assert jnp.allclose(out1, ref1, atol=1e-5, rtol=1e-5), "mismatch (last-dim GLU)"

    # Case 2: channel-first (B, 2C, T), GLU along dim=1 (how the model uses it),
    # handled natively via BlockSpecs -- no transpose.
    B2, C2, T2 = 2, 32, 128
    x2 = jax.random.normal(k2, (B2, 2 * C2, T2), dtype=jnp.float32)
    out2 = jax.block_until_ready(glu(x2, dim=1))
    a2, g2 = jnp.split(x2, 2, axis=1)
    ref2 = a2 * jax.nn.sigmoid(g2)
    assert out2.shape == ref2.shape
    assert jnp.allclose(out2, ref2, atol=1e-5, rtol=1e-5), "mismatch (mid-dim GLU)"

    print("KERNEL_OK")
</pallas_src>

<mosaic_0001>
module attributes {stable_mosaic.version = 11 : i64} {
  func.func @_glu_split_kernel(%arg0: i32, %arg1: memref<256x128xf32, #tpu.memory_space<vmem>>, %arg2: memref<256x128xf32, #tpu.memory_space<vmem>>, %arg3: memref<256x128xf32, #tpu.memory_space<vmem>>) attributes {dimension_semantics = [#tpu.dimension_semantics<parallel>], iteration_bounds = array<i64: 4>, scalar_prefetch = 0 : i64, scratch_operands = 0 : i64, tpu.core_type = #tpu.core_type<tc>, window_params = [{transform_indices = @transform_0, window_bounds = array<i64: 256, 128>}, {transform_indices = @transform_1, window_bounds = array<i64: 256, 128>}, {transform_indices = @transform_2, window_bounds = array<i64: 256, 128>}]} {
    %c0 = arith.constant 0 : index
    %c0_0 = arith.constant 0 : index
    %0 = vector.load %arg1[%c0, %c0_0] : memref<256x128xf32, #tpu.memory_space<vmem>>, vector<256x128xf32>
    %c0_1 = arith.constant 0 : index
    %c0_2 = arith.constant 0 : index
    %1 = vector.load %arg2[%c0_1, %c0_2] : memref<256x128xf32, #tpu.memory_space<vmem>>, vector<256x128xf32>
    %2 = arith.negf %1 : vector<256x128xf32>
    %3 = math.exp %2 : vector<256x128xf32>
    %cst = arith.constant 1.000000e+00 : f32
    %4 = vector.broadcast %cst : f32 to vector<256x128xf32>
    %5 = arith.addf %4, %3 : vector<256x128xf32>
    %6 = arith.divf %4, %5 : vector<256x128xf32>
    %7 = arith.mulf %0, %6 : vector<256x128xf32>
    %c0_3 = arith.constant 0 : index
    %c0_4 = arith.constant 0 : index
    %8 = vector.load %arg3[%c0_3, %c0_4] : memref<256x128xf32, #tpu.memory_space<vmem>>, vector<256x128xf32>
    tpu.vector_store %arg3[%c0_3, %c0_4], %7 {strides = array<i32>} : memref<256x128xf32, #tpu.memory_space<vmem>>, vector<256x128xf32>,
    return
  }
  func.func @transform_0(%arg0: i32) -> (i32, i32) {
    %c0_i32 = arith.constant 0 : i32
    %c0_i32_0 = arith.constant 0 : i32
    return %arg0, %c0_i32 : i32, i32
  }
  func.func @transform_1(%arg0: i32) -> (i32, i32) {
    %c1_i32 = arith.constant 1 : i32
    %c0_i32 = arith.constant 0 : i32
    return %arg0, %c1_i32 : i32, i32
  }
  func.func @transform_2(%arg0: i32) -> (i32, i32) {
    %c0_i32 = arith.constant 0 : i32
    %c0_i32_0 = arith.constant 0 : i32
    return %arg0, %c0_i32 : i32, i32
  }
}

</mosaic_0001>

<bundles_post_ra>
// kernel: tpu_custom_call.1
= control target key start
LH: loop header
LB: loop body
LE: loop exit
PB: predicated region body
PF: predicated region fallthrough
CT: control target
= control target key end

     0   :  { %7 = vsyncpa [#allocation3], 0  ;;  %s1365_s0 = inlined_call_operand.hbm [shape: f32[1024,256], index: 0, kind: input, shape index: {}]   ;;  %s1366_s1 = inlined_call_operand.hbm [shape: f32[1024,256], index: 1, kind: input, shape index: {}]   ;;  %s1367_s2 = inlined_call_operand.hbm [shape: f32[1024,128], index: 2, kind: output, shape index: {}]  }
   0x1   :  { %9 = vsyncpa [#allocation3 + $0x1], 0 }
   0x2   :  { %10 = vsyncpa [#allocation6], 0 }
   0x3   :  { %12 = vsyncpa [#allocation6 + $0x1], 0 }
   0x4   :  { %13 = vsyncpa [#allocation4], 0 }
   0x5   :  { %15 = vsyncpa [#allocation4 + $0x1], 0  ;;  %s1035_s9 = smov 0   ;;  %s1037_s10 = smov 0  }
   0x6   :  { %s1039_s11 = smov 0   ;;  %s1041_s12 = smov 0  }
   0x7 LB: > { %s1056_s13 = sadd.s32 4294967295, %s1010_s12   ;;  %s640_s14 = sadd.s32 4294967294, %s1010_s12   ;;  %s1010_s12 = sphi %s1041_s12, %s1383_s12   ;;  %s1006_s11 = sphi %s1039_s11, %s1382_s11   ;;  %s1002_s10 = sphi %s1037_s10, %s1381_s10   ;;  %s998_s9 = sphi %s1035_s9, %s1380_s9  }
   0x8   : > { %s1060_s15 = sadd.s32 1, %s1010_s12   ;;  %s28_s16 = sadd.s32 1, %s1006_s11 }
   0x9   : > { %s25_s17 = ssub.s32 %s1010_s12, %s1060_s15  ;;  %p35_p0 = scmp.ne.s32.totalorder %s1006_s11, %s1002_s10 }
   0xa   : > { %p26_p1 = scmp.eq.s32.totalorder %s25_s17, 0  ;;  %p36_p2 = scmp.eq.s32.totalorder %s1010_s12, 0 }
   0xb   : > { %p41_p3 = scmp.ne.s32.totalorder %s1002_s10, %s998_s9  ;;  %p42_p4 = scmp.eq.s32.totalorder %s1056_s13, 0 }
   0xc   : > { %s1072_s18 = scalar_select %p26_p1, %s1006_s11, %s28_s16  }
   0xd   : > { %p1074_p5 = por %p36_p2, %p35_p0  ;;  %p1078_p6 = por %p42_p4, %p41_p3 }
   0xe   : > { %p91_p7 = scmp.eq.s32.totalorder %s1056_s13, 3  ;;  %p97_p8 = scmp.eq.s32.totalorder %s640_s14, 3 }
   0xf   : > { %s1371_s20 = scalar_select %p1078_p6, 1, 0 }
  0x10   : > { %p712_p9 = scmp.lt.s32.totalorder %s1010_s12, 4  ;;  %p1084_p10 = por %p91_p7, %p35_p0 }
  0x11   : > { %p1088_p11 = por %p97_p8, %p41_p3  ;;  %s1093_s23 = sand.u32 1, %s1006_s11  }
  0x12   : > { %s1372_s21 = scalar_select %p1084_p10, 1, 0 }
  0x13   : > { %s1373_s22 = scalar_select %p1088_p11, 1, 0 }
  0x14   : > { %s692_s24 = sshll.u32 %s1010_s12, 13  ;;  %s643_s25 = sshll.u32 %s1093_s23, 8 }
  0x15   : > { %s1102_s28 = scalar_lea.hbm %s1365_s0, %s692_s24  ;;  %s121_s29 = scalar_lea.vmem [#allocation2], %s643_s25 }
  0x16   : > { %s129_s30 = sshll.u32 %s121_s29, 4  ;;  %p1108_p12 = pnand %p712_p9, %p1074_p5  ;;  %s1112_s30 = int_to_ptr.vmem [resolvable:$true] %s129_s30 }
  0x17   : > { %s118_s4 = scalar_lea.sflag [#allocation3], %s1093_s23  ;;  %s879_s5 = scalar_lea.hbm %s1102_s28, 4096 }
  0x18   : > { %p880_p0 = scmp.ne.s32.totalorder %s1102_s28, %s879_s5  ;;  %p881_p1 = pneg %p1108_p12 }
  0x19   : > { %s884_s8 = scalar_lea.hbm %s1365_s0, 32768  ;;  %p885_p4 = scmp.lt.u32.totalorder %s1102_s28, %s1365_s0 }
  0x1a   : > { %p882_p2 = pnand %p881_p1, %p880_p0  ;;  %p886_p5 = scmp.lt.u32.totalorder %s884_s8, %s879_s5 }
  0x1b   : > { %p888_p8 = scmp.lt.u32.totalorder %s879_s5, %s1102_s28 }
  0x1c   : > { %p883_p3 = pneg %p882_p2  ;;  %p887_p7 = por %p886_p5, %p885_p4 }
  0x1e   : > { %p889_p9 = por %p888_p8, %p887_p7 }
  0x20   : > { %p890_p13 = pnand %p889_p9, %p883_p3 }
  0x22   : > { %893 = shalt.err (!%p890_p13)
}
  0x23   : > { %s894_s17 = scalar_lea.vmem %s1112_s30, 4096  ;;  %s1012_s19 = smov [#allocation2]  }
  0x24   : > { %p895_p0 = scmp.ne.s32.totalorder %s1112_s30, %s894_s17  ;;  %s899_s26 = sshll.u32 %s1012_s19, 4  ;;  %s900_s26 = int_to_ptr.vmem [resolvable:$false] %s899_s26 }
  0x25   : > { %s901_s27 = scalar_lea.vmem %s900_s26, 8192  ;;  %p902_p10 = scmp.lt.s32.totalorder %s1112_s30, %s900_s26 }
  0x26   : > { %p897_p2 = pnand %p895_p0, %p881_p1  ;;  %p903_p4 = scmp.lt.s32.totalorder %s901_s27, %s894_s17 }
  0x28   : > { %p898_p11 = pneg %p897_p2  ;;  %p904_p5 = por %p903_p4, %p902_p10 }
  0x2a   : > { %p905_p7 = pnand %p904_p5, %p898_p11 }
  0x2c   : > { %908 = shalt.err (!%p905_p7)
}
  0x2d   : > { %s1013_s29 = smov 256   ;;  %s1014_s5 = smov 128  }
  0x2e   : > { %s1015_s6 = smov 8   ;;  %p160_p10 = scmp.lt.s32.totalorder %s1010_s12, 5 }
  0x2f   : > { %704 = dma.hbm_to_vmem [thread:$0]  (!%p1108_p12), %s1102_s28, 4096, %s1112_s30, %s118_s4, %s1013_s29, %s1014_s5, %s1015_s6  }
  0x30   : > { %s582_s14 = scalar_lea.hbm %s1366_s1, %s692_s24  ;;  %p1375_p11 = scmp.ge.s32.totalorder %s1010_s12, 1 }
  0x31   : > { %s1158_s17 = scalar_lea.hbm %s582_s14, 128  ;;  %s143_s19 = scalar_lea.vmem [#allocation5], %s643_s25 }
  0x32   : > { %p1154_p13 = pnand %p1375_p11, %p160_p10  ;;  %s152_s26 = sshll.u32 %s143_s19, 4  ;;  %s1162_s26 = int_to_ptr.vmem [resolvable:$true] %s152_s26 }
  0x33   : > { %s140_s28 = scalar_lea.sflag [#allocation6], %s1093_s23  ;;  %s939_s30 = scalar_lea.hbm %s582_s14, 4224 }
  0x34   : > { %p910_p3 = scmp.ne.s32.totalorder %s1158_s17, %s939_s30  ;;  %s914_s27 = scalar_lea.hbm %s1366_s1, 32768 }
  0x35   : > { %p915_p0 = scmp.lt.u32.totalorder %s1158_s17, %s1366_s1  ;;  %p916_p2 = scmp.lt.u32.totalorder %s914_s27, %s939_s30 }
  0x36   : > { %p912_p8 = pnand %p910_p3, %p881_p1  ;;  %p918_p5 = scmp.lt.u32.totalorder %s939_s30, %s1158_s17 }
  0x37   : > { %p917_p4 = por %p916_p2, %p915_p0 }
  0x38   : > { %p913_p9 = pneg %p912_p8 }
  0x39   : > { %p919_p7 = por %p918_p5, %p917_p4 }
  0x3b   : > { %p920_p10 = pnand %p919_p7, %p913_p9 }
  0x3d   : > { %923 = shalt.err (!%p920_p10)
}
  0x3e   : > { %s924_s25 = scalar_lea.vmem %s1162_s26, 4096  ;;  %s1016_s14 = smov [#allocation5]  }
  0x3f   : > { %p925_p11 = scmp.ne.s32.totalorder %s1162_s26, %s924_s25  ;;  %s929_s19 = sshll.u32 %s1016_s14, 4  ;;  %s930_s19 = int_to_ptr.vmem [resolvable:$false] %s929_s19 }
  0x40   : > { %s931_s24 = scalar_lea.vmem %s930_s19, 8192  ;;  %p932_p6 = scmp.lt.s32.totalorder %s1162_s26, %s930_s19 }
  0x41   : > { %p927_p3 = pnand %p925_p11, %p881_p1  ;;  %p933_p0 = scmp.lt.s32.totalorder %s931_s24, %s924_s25 }
  0x43   : > { %p928_p8 = pneg %p927_p3  ;;  %p934_p2 = por %p933_p0, %p932_p6 }
  0x45   : > { %p935_p4 = pnand %p934_p2, %p928_p8 }
  0x47   : > { %938 = shalt.err (!%p935_p4)
}
  0x48   : > { %707 = dma.hbm_to_vmem [thread:$0]  (!%p1108_p12), %s1158_s17, 4096, %s1162_s26, %s140_s28, %s1013_s29, %s1014_s5, %s1015_s6  }
  0x49   : > { %164 = sbr.rel (%p1154_p13) target bundleno = 184 (0xb8), region = 28  ;;  %s1195_s30 = sand.u32 (!%p1154_p13), 1, %s1002_s10  }
  0x4a   : > { %s1198_s4 = sshll.u32 (!%p1154_p13), %s1195_s30, 8  ;;  %s167_s3 = scalar_lea.sflag (!%p1154_p13), [#allocation3], %s1195_s30 }
  0x4b   : > { %s1202_s27 = scalar_lea.vmem (!%p1154_p13), [#allocation2], %s1198_s4  ;;  %p1377_p6 = scmp.ne.s32.totalorder (!%p1154_p13), %s1371_s20, 0 }
  0x50   : > { %985 = dma.done.wait (%p1377_p6), %s167_s3, 4096  }
  0x51   : > { %987 = vsyncadd (%p1377_p6), %s167_s3, 4294963200  ;;  %s176_s23 = scalar_lea.sflag [#allocation6], %s1195_s30  ;;  %s1210_s29 = scalar_lea.vmem [#allocation5], %s1198_s4 }
  0x52   : > { %989 = dma.done.wait (%p1377_p6), %s176_s23, 4096  }
  0x53   : > { %991 = vsyncadd (%p1377_p6), %s176_s23, 4294963200  ;;  %v240_v0 = vld [vmem:[%s1210_s29] sm:$0xff]  ;;  %v241_v2 = vld [vmem:[%s1210_s29 + $0x8] sm:$0xff]  ;;  %s1242_s20 = scalar_lea.vmem [#allocation7], %s1198_s4  ;;  %s694_s5 = sshll.u32 %s1056_s13, 12 }
  0x54   : > { %v654_v1 = vmul.f32 -1.442695, %v240_v0  ;;  %v242_v3 = vld [vmem:[%s1210_s29 + $0x10] sm:$0xff]  ;;  %v655_v4 = vmul.f32 -1.442695, %v241_v2  ;;  %v243_v6 = vld [vmem:[%s1210_s29 + $0x18] sm:$0xff]  ;;  %s1317_s26 = scalar_lea.hbm %s1367_s2, %s694_s5 }
  0x55   : > { %v656_v5 = vmul.f32 -1.442695, %v242_v3  ;;  %v657_v7 = vmul.f32 -1.442695, %v243_v6  ;;  %v244_v8 = vld [vmem:[%s1210_s29 + $0x20] sm:$0xff]  ;;  %v245_v10 = vld [vmem:[%s1210_s29 + $0x28] sm:$0xff] }
  0x56   : > { %751 = vpow2.f32 %v654_v1  ;;  %v658_v9 = vmul.f32 -1.442695, %v244_v8  ;;  %v246_v11 = vld [vmem:[%s1210_s29 + $0x30] sm:$0xff]  ;;  %v659_v12 = vmul.f32 -1.442695, %v245_v10  ;;  %v247_v14 = vld [vmem:[%s1210_s29 + $0x38] sm:$0xff] }
  0x57   : > { %753 = vpow2.f32 %v655_v4  ;;  %v660_v13 = vmul.f32 -1.442695, %v246_v11  ;;  %v661_v15 = vmul.f32 -1.442695, %v247_v14  ;;  %v248_v16 = vld [vmem:[%s1210_s29 + $0x40] sm:$0xff]  ;;  %v249_v18 = vld [vmem:[%s1210_s29 + $0x48] sm:$0xff] }
  0x58   : > { %755 = vpow2.f32 %v656_v5  ;;  %v662_v17 = vmul.f32 -1.442695, %v248_v16  ;;  %v250_v19 = vld [vmem:[%s1210_s29 + $0x50] sm:$0xff]  ;;  %v663_v20 = vmul.f32 -1.442695, %v249_v18  ;;  %v251_v21 = vld [vmem:[%s1210_s29 + $0x58] sm:$0xff] }
  0x59   : > { %757 = vpow2.f32 %v657_v7  ;;  %v664_v22 = vmul.f32 -1.442695, %v250_v19  ;;  %v252_v23 = vld [vmem:[%s1210_s29 + $0x60] sm:$0xff]  ;;  %v665_v24 = vmul.f32 -1.442695, %v251_v21  ;;  %v253_v45 = vld [vmem:[%s1210_s29 + $0x68] sm:$0xff] }
  0x5a   : > { %759 = vpow2.f32 %v658_v9  ;;  %v666_v25 = vmul.f32 -1.442695, %v252_v23  ;;  %v254_v48 = vld [vmem:[%s1210_s29 + $0x70] sm:$0xff]  ;;  %v208_v50 = vld [vmem:[%s1202_s27] sm:$0xff]  ;;  %v255_v52 = vld [vmem:[%s1210_s29 + $0x78] sm:$0xff]  ;;  %s542_s6 = sshll.u32 %s1242_s20, 4  ;;  %s1319_s6 = int_to_ptr.vmem [resolvable:$true] %s542_s6 }
  0x5b   : > { %761 = vpow2.f32 %v659_v12  ;;  %v209_v54 = vld [vmem:[%s1202_s27 + $0x8] sm:$0xff]  ;;  %v667_v56 = vmul.f32 -1.442695, %v253_v45  ;;  %v256_v57 = vld [vmem:[%s1210_s29 + $0x80] sm:$0xff]  ;;  %v210_v59 = vld [vmem:[%s1202_s27 + $0x10] sm:$0xff]  ;;  %s529_s13 = scalar_lea.sflag [#allocation4], %s1195_s30 }
  0x5c   : > { %763 = vpow2.f32 %v660_v13  ;;  %v668_v61 = vmul.f32 -1.442695, %v254_v48  ;;  %v257_v62 = vld [vmem:[%s1210_s29 + $0x88] sm:$0xff]  ;;  %v211_v1 = vld [vmem:[%s1202_s27 + $0x18] sm:$0xff]  ;;  %v669_v2 = vmul.f32 -1.442695, %v255_v52 }
  0x5d   : > { %765 = vpow2.f32 %v661_v15  ;;  %v258_v3 = vld [vmem:[%s1210_s29 + $0x90] sm:$0xff]  ;;  %v212_v6 = vld [vmem:[%s1202_s27 + $0x20] sm:$0xff]  ;;  %v670_v7 = vmul.f32 -1.442695, %v256_v57  ;;  %v259_v8 = vld [vmem:[%s1210_s29 + $0x98] sm:$0xff]  ;;  %s940_s28 = scalar_lea.vmem %s1319_s6, 4096 }
  0x5e   : > { %767 = vpow2.f32 %v662_v17  ;;  %v213_v11 = vld [vmem:[%s1202_s27 + $0x28] sm:$0xff]  ;;  %v671_v12 = vmul.f32 -1.442695, %v257_v62  ;;  %v260_v13 = vld [vmem:[%s1210_s29 + $0xa0] sm:$0xff]  ;;  %v214_v16 = vld [vmem:[%s1202_s27 + $0x30] sm:$0xff]  ;;  %p941_p12 = scmp.ne.s32.totalorder %s1319_s6, %s940_s28  ;;  %p1378_p1 = scmp.ne.s32.totalorder %s1372_s21, 0 }
  0x5f   : > { %769 = vpow2.f32 %v663_v20  ;;  %v672_v17 = vmul.f32 -1.442695, %v258_v3  ;;  %v261_v18 = vld [vmem:[%s1210_s29 + $0xa8] sm:$0xff]  ;;  %v215_v21 = vld [vmem:[%s1202_s27 + $0x38] sm:$0xff]  ;;  %v262_v23 = vld [vmem:[%s1210_s29 + $0xb0] sm:$0xff]  ;;  %s1017_s7 = smov [#allocation7]  }
  0x60   : > { %v752_v26 = vpop.eup %751  ;;  %771 = vpow2.f32 %v664_v22  ;;  %v673_v22 = vmul.f32 -1.442695, %v259_v8  ;;  %v220_v45 = vld [vmem:[%s1202_s27 + $0x60] sm:$0xff]  ;;  %v266_v8 = vld [vmem:[%s1210_s29 + $0xd0] sm:$0xff]  ;;  %p942_p13 = pnand %p941_p12, %p1378_p1  ;;  %s944_s8 = sshll.u32 %s1017_s7, 4  ;;  %s945_s8 = int_to_ptr.vmem [resolvable:$false] %s944_s8 }
  0x61   : > { %v754_v27 = vpop.eup %753  ;;  %v368_v28 = vadd.f32 1.0, %v752_v26  ;;  %773 = vpow2.f32 %v665_v24  ;;  %v216_v26 = vld [vmem:[%s1202_s27 + $0x40] sm:$0xff]  ;;  %s946_s25 = scalar_lea.vmem %s945_s8, 8192  ;;  %p947_p5 = scmp.lt.s32.totalorder %s1319_s6, %s945_s8 }
  0x62   : > { %v756_v29 = vpop.eup %755  ;;  %v369_v30 = vadd.f32 1.0, %v754_v27  ;;  %775 = vpow2.f32 %v666_v25  ;;  %v674_v27 = vmul.f32 -1.442695, %v260_v13  ;;  %v221_v13 = vld [vmem:[%s1202_s27 + $0x68] sm:$0xff]  ;;  %p943_p9 = pneg %p942_p13  ;;  %p948_p7 = scmp.lt.s32.totalorder %s946_s25, %s940_s28 }
  0x63   : > { %v758_v31 = vpop.eup %757  ;;  %777 = vrcp.f32 %v368_v28  ;;  %v370_v32 = vadd.f32 1.0, %v756_v29  ;;  %v263_v28 = vld [vmem:[%s1210_s29 + $0xb8] sm:$0xff] }
  0x64   : > { %v760_v33 = vpop.eup %759  ;;  %779 = vrcp.f32 %v369_v30  ;;  %v371_v34 = vadd.f32 1.0, %v758_v31  ;;  %v217_v31 = vld [vmem:[%s1202_s27 + $0x48] sm:$0xff]  ;;  %p949_p10 = por %p948_p7, %p947_p5 }
  0x65   : > { %v762_v35 = vpop.eup %761  ;;  %781 = vrcp.f32 %v370_v32  ;;  %v372_v36 = vadd.f32 1.0, %v760_v33  ;;  %v675_v32 = vmul.f32 -1.442695, %v261_v18  ;;  %v264_v33 = vld [vmem:[%s1210_s29 + $0xc0] sm:$0xff] }
  0x66   : > { %v764_v37 = vpop.eup %763  ;;  %783 = vrcp.f32 %v371_v34  ;;  %v373_v38 = vadd.f32 1.0, %v762_v35  ;;  %p950_p11 = pnand %p949_p10, %p943_p9 }
  0x67   : > { %v766_v39 = vpop.eup %765  ;;  %785 = vrcp.f32 %v372_v36  ;;  %v374_v40 = vadd.f32 1.0, %v764_v37  ;;  %v218_v36 = vld [vmem:[%s1202_s27 + $0x50] sm:$0xff]  ;;  %v676_v37 = vmul.f32 -1.442695, %v262_v23 }
  0x68   : > { %v768_v41 = vpop.eup %767  ;;  %787 = vrcp.f32 %v373_v38  ;;  %v375_v42 = vadd.f32 1.0, %v766_v39  ;;  %v265_v38 = vld [vmem:[%s1210_s29 + $0xc8] sm:$0xff] }
  0x69   : > { %v770_v43 = vpop.eup %769  ;;  %789 = vrcp.f32 %v374_v40  ;;  %v376_v44 = vadd.f32 1.0, %v768_v41  ;;  %v219_v41 = vld [vmem:[%s1202_s27 + $0x58] sm:$0xff] }
  0x6a   : > { %v772_v46 = vpop.eup %771  ;;  %791 = vrcp.f32 %v375_v42  ;;  %v377_v47 = vadd.f32 1.0, %v770_v43  ;;  %v677_v42 = vmul.f32 -1.442695, %v263_v28  ;;  %v224_v28 = vld [vmem:[%s1202_s27 + $0x80] sm:$0xff] }
  0x6b   : > { %v774_v49 = vpop.eup %773  ;;  %793 = vrcp.f32 %v376_v44  ;;  %v378_v51 = vadd.f32 1.0, %v772_v46  ;;  %v678_v46 = vmul.f32 -1.442695, %v264_v33  ;;  %v225_v33 = vld [vmem:[%s1202_s27 + $0x88] sm:$0xff] }
  0x6c   : > { %v776_v53 = vpop.eup %775  ;;  %795 = vrcp.f32 %v377_v47  ;;  %v379_v55 = vadd.f32 1.0, %v774_v49  ;;  %v679_v49 = vmul.f32 -1.442695, %v265_v38 }
  0x6d   : > { %v778_v58 = vpop.eup %777  ;;  %797 = vrcp.f32 %v378_v51  ;;  %v380_v60 = vadd.f32 1.0, %v776_v53 }
  0x6e   : > { %v780_v63 = vpop.eup %779  ;;  %v464_v0 = vmul.f32 %v778_v58, %v208_v50  ;;  %799 = vrcp.f32 %v379_v55 }
  0x6f   : > { %v782_v4 = vpop.eup %781  ;;  %v465_v5 = vmul.f32 %v780_v63, %v209_v54  ;;  %801 = vrcp.f32 %v380_v60 }
  0x70   : > { %v784_v9 = vpop.eup %783  ;;  %496 = vst [vmem:[%s1242_s20] sm:$0xff] %v464_v0  ;;  %v466_v10 = vmul.f32 %v782_v4, %v210_v59  ;;  %803 = vpow2.f32 %v667_v56 }
  0x71   : > { %v786_v14 = vpop.eup %785  ;;  %497 = vst [vmem:[%s1242_s20 + $0x8] sm:$0xff] %v465_v5  ;;  %v467_v15 = vmul.f32 %v784_v9, %v211_v1  ;;  %805 = vpow2.f32 %v668_v61 }
  0x72   : > { %v788_v19 = vpop.eup %787  ;;  %498 = vst [vmem:[%s1242_s20 + $0x10] sm:$0xff] %v466_v10  ;;  %v468_v20 = vmul.f32 %v786_v14, %v212_v6  ;;  %807 = vpow2.f32 %v669_v2 }
  0x73   : > { %v790_v24 = vpop.eup %789  ;;  %499 = vst [vmem:[%s1242_s20 + $0x18] sm:$0xff] %v467_v15  ;;  %v469_v25 = vmul.f32 %v788_v19, %v213_v11  ;;  %809 = vpow2.f32 %v670_v7  ;;  %v267_v11 = vld [vmem:[%s1210_s29 + $0xd8] sm:$0xff]  ;;  %v268_v15 = vld [vmem:[%s1210_s29 + $0xe0] sm:$0xff]  ;;  %v680_v19 = vmul.f32 -1.442695, %v266_v8 }
  0x74   : > { %v792_v29 = vpop.eup %791  ;;  %500 = vst [vmem:[%s1242_s20 + $0x20] sm:$0xff] %v468_v20  ;;  %v470_v30 = vmul.f32 %v790_v24, %v214_v16  ;;  %811 = vpow2.f32 %v671_v12  ;;  %v269_v20 = vld [vmem:[%s1210_s29 + $0xe8] sm:$0xff]  ;;  %v681_v24 = vmul.f32 -1.442695, %v267_v11 }
  0x75   : > { %v794_v34 = vpop.eup %793  ;;  %501 = vst [vmem:[%s1242_s20 + $0x28] sm:$0xff] %v469_v25  ;;  %v471_v35 = vmul.f32 %v792_v29, %v215_v21  ;;  %813 = vpow2.f32 %v672_v17  ;;  %v222_v17 = vld [vmem:[%s1202_s27 + $0x70] sm:$0xff]  ;;  %v682_v29 = vmul.f32 -1.442695, %v268_v15  ;;  %v235_v15 = vld [vmem:[%s1202_s27 + $0xd8] sm:$0xff] }
  0x76   : > { %v796_v39 = vpop.eup %795  ;;  %502 = vst [vmem:[%s1242_s20 + $0x30] sm:$0xff] %v470_v30  ;;  %v472_v40 = vmul.f32 %v794_v34, %v216_v26  ;;  %815 = vpow2.f32 %v673_v22  ;;  %v223_v22 = vld [vmem:[%s1202_s27 + $0x78] sm:$0xff]  ;;  %v270_v25 = vld [vmem:[%s1210_s29 + $0xf0] sm:$0xff]  ;;  %v683_v34 = vmul.f32 -1.442695, %v269_v20  ;;  %v237_v20 = vld [vmem:[%s1202_s27 + $0xe8] sm:$0xff] }
  0x77   : > { %v798_v43 = vpop.eup %797  ;;  %503 = vst [vmem:[%s1242_s20 + $0x38] sm:$0xff] %v471_v35  ;;  %v473_v44 = vmul.f32 %v796_v39, %v217_v31  ;;  %817 = vpow2.f32 %v674_v27  ;;  %v271_v30 = vld [vmem:[%s1210_s29 + $0xf8] sm:$0xff]  ;;  %v684_v38 = vmul.f32 -1.442695, %v270_v25 }
  0x78   : > { %v800_v47 = vpop.eup %799  ;;  %504 = vst [vmem:[%s1242_s20 + $0x40] sm:$0xff] %v472_v40  ;;  %v474_v48 = vmul.f32 %v798_v43, %v218_v36  ;;  %819 = vpow2.f32 %v675_v32 }
  0x79   : > { %v802_v50 = vpop.eup %801  ;;  %505 = vst [vmem:[%s1242_s20 + $0x48] sm:$0xff] %v473_v44  ;;  %v475_v51 = vmul.f32 %v800_v47, %v219_v41  ;;  %821 = vpow2.f32 %v676_v37  ;;  %v226_v37 = vld [vmem:[%s1202_s27 + $0x90] sm:$0xff]  ;;  %v227_v41 = vld [vmem:[%s1202_s27 + $0x98] sm:$0xff] }
  0x7a   : > { %v804_v52 = vpop.eup %803  ;;  %506 = vst [vmem:[%s1242_s20 + $0x50] sm:$0xff] %v474_v48  ;;  %v476_v53 = vmul.f32 %v802_v50, %v220_v45  ;;  %823 = vpow2.f32 %v677_v42  ;;  %v685_v42 = vmul.f32 -1.442695, %v271_v30  ;;  %v228_v45 = vld [vmem:[%s1202_s27 + $0xa0] sm:$0xff]  ;;  %v229_v48 = vld [vmem:[%s1202_s27 + $0xa8] sm:$0xff] }
  0x7b   : > { %v806_v54 = vpop.eup %805  ;;  %507 = vst [vmem:[%s1242_s20 + $0x58] sm:$0xff] %v475_v51  ;;  %v381_v55 = vadd.f32 1.0, %v804_v52  ;;  %825 = vpow2.f32 %v678_v46  ;;  %v230_v51 = vld [vmem:[%s1202_s27 + $0xb0] sm:$0xff] }
  0x7c   : > { %v808_v56 = vpop.eup %807  ;;  %508 = vst [vmem:[%s1242_s20 + $0x60] sm:$0xff] %v476_v53  ;;  %v382_v57 = vadd.f32 1.0, %v806_v54  ;;  %827 = vpow2.f32 %v679_v49  ;;  %v231_v54 = vld [vmem:[%s1202_s27 + $0xb8] sm:$0xff] }
  0x7d   : > { %v810_v58 = vpop.eup %809  ;;  %829 = vrcp.f32 %v381_v55  ;;  %v383_v59 = vadd.f32 1.0, %v808_v56 }
  0x7e   : > { %v812_v60 = vpop.eup %811  ;;  %831 = vrcp.f32 %v382_v57  ;;  %v384_v61 = vadd.f32 1.0, %v810_v58  ;;  %v232_v57 = vld [vmem:[%s1202_s27 + $0xc0] sm:$0xff] }
  0x7f   : > { %v814_v62 = vpop.eup %813  ;;  %833 = vrcp.f32 %v383_v59  ;;  %v385_v63 = vadd.f32 1.0, %v812_v60  ;;  %v233_v60 = vld [vmem:[%s1202_s27 + $0xc8] sm:$0xff] }
  0x80   : > { %v816_v0 = vpop.eup %815  ;;  %835 = vrcp.f32 %v384_v61  ;;  %v386_v1 = vadd.f32 1.0, %v814_v62 }
  0x81   : > { %v818_v2 = vpop.eup %817  ;;  %837 = vrcp.f32 %v385_v63  ;;  %v387_v3 = vadd.f32 1.0, %v816_v0 }
  0x82   : > { %v820_v4 = vpop.eup %819  ;;  %839 = vrcp.f32 %v386_v1  ;;  %v388_v5 = vadd.f32 1.0, %v818_v2 }
  0x83   : > { %v822_v6 = vpop.eup %821  ;;  %841 = vrcp.f32 %v387_v3  ;;  %v389_v7 = vadd.f32 1.0, %v820_v4 }
  0x84   : > { %v824_v9 = vpop.eup %823  ;;  %843 = vrcp.f32 %v388_v5  ;;  %v390_v10 = vadd.f32 1.0, %v822_v6 }
  0x85   : > { %v826_v12 = vpop.eup %825  ;;  %845 = vrcp.f32 %v389_v7  ;;  %v391_v14 = vadd.f32 1.0, %v824_v9 }
  0x86   : > { %v828_v16 = vpop.eup %827  ;;  %847 = vrcp.f32 %v390_v10  ;;  %v392_v18 = vadd.f32 1.0, %v826_v12 }
  0x87   : > { %v830_v21 = vpop.eup %829  ;;  %849 = vrcp.f32 %v391_v14  ;;  %v393_v23 = vadd.f32 1.0, %v828_v16  ;;  %v234_v14 = vld [vmem:[%s1202_s27 + $0xd0] sm:$0xff] }
  0x88   : > { %v832_v26 = vpop.eup %831  ;;  %v477_v27 = vmul.f32 %v830_v21, %v221_v13  ;;  %851 = vrcp.f32 %v392_v18 }
  0x89   : > { %v834_v31 = vpop.eup %833  ;;  %v478_v32 = vmul.f32 %v832_v26, %v222_v17  ;;  %853 = vrcp.f32 %v393_v23  ;;  %v236_v17 = vld [vmem:[%s1202_s27 + $0xe0] sm:$0xff]  ;;  %v238_v23 = vld [vmem:[%s1202_s27 + $0xf0] sm:$0xff]  ;;  %v239_v26 = vld [vmem:[%s1202_s27 + $0xf8] sm:$0xff] }
  0x8a   : > { %v836_v35 = vpop.eup %835  ;;  %509 = vst [vmem:[%s1242_s20 + $0x68] sm:$0xff] %v477_v27  ;;  %v479_v36 = vmul.f32 %v834_v31, %v223_v22  ;;  %855 = vpow2.f32 %v680_v19 }
  0x8b   : > { %v838_v39 = vpop.eup %837  ;;  %510 = vst [vmem:[%s1242_s20 + $0x70] sm:$0xff] %v478_v32  ;;  %v480_v40 = vmul.f32 %v836_v35, %v224_v28  ;;  %857 = vpow2.f32 %v681_v24 }
  0x8c   : > { %v840_v43 = vpop.eup %839  ;;  %511 = vst [vmem:[%s1242_s20 + $0x78] sm:$0xff] %v479_v36  ;;  %v481_v44 = vmul.f32 %v838_v39, %v225_v33  ;;  %859 = vpow2.f32 %v682_v29 }
  0x8d   : > { %v842_v46 = vpop.eup %841  ;;  %512 = vst [vmem:[%s1242_s20 + $0x80] sm:$0xff] %v480_v40  ;;  %v482_v47 = vmul.f32 %v840_v43, %v226_v37  ;;  %861 = vpow2.f32 %v683_v34 }
  0x8e   : > { %v844_v49 = vpop.eup %843  ;;  %513 = vst [vmem:[%s1242_s20 + $0x88] sm:$0xff] %v481_v44  ;;  %v483_v50 = vmul.f32 %v842_v46, %v227_v41  ;;  %863 = vpow2.f32 %v684_v38 }
  0x8f   : > { %v846_v52 = vpop.eup %845  ;;  %514 = vst [vmem:[%s1242_s20 + $0x90] sm:$0xff] %v482_v47  ;;  %v484_v53 = vmul.f32 %v844_v49, %v228_v45  ;;  %865 = vpow2.f32 %v685_v42 }
  0x90   : > { %v848_v55 = vpop.eup %847  ;;  %515 = vst [vmem:[%s1242_s20 + $0x98] sm:$0xff] %v483_v50  ;;  %v485_v56 = vmul.f32 %v846_v52, %v229_v48 }
  0x91   : > { %v850_v58 = vpop.eup %849  ;;  %516 = vst [vmem:[%s1242_s20 + $0xa0] sm:$0xff] %v484_v53  ;;  %v486_v59 = vmul.f32 %v848_v55, %v230_v51 }
  0x92   : > { %v852_v61 = vpop.eup %851  ;;  %517 = vst [vmem:[%s1242_s20 + $0xa8] sm:$0xff] %v485_v56  ;;  %v487_v62 = vmul.f32 %v850_v58, %v231_v54 }
  0x93   : > { %v854_v63 = vpop.eup %853  ;;  %518 = vst [vmem:[%s1242_s20 + $0xb0] sm:$0xff] %v486_v59  ;;  %v488_v0 = vmul.f32 %v852_v61, %v232_v57 }
  0x94   : > { %v856_v1 = vpop.eup %855  ;;  %519 = vst [vmem:[%s1242_s20 + $0xb8] sm:$0xff] %v487_v62  ;;  %v489_v2 = vmul.f32 %v854_v63, %v233_v60 }
  0x95   : > { %v858_v3 = vpop.eup %857  ;;  %520 = vst [vmem:[%s1242_s20 + $0xc0] sm:$0xff] %v488_v0  ;;  %v394_v4 = vadd.f32 1.0, %v856_v1 }
  0x96   : > { %v860_v5 = vpop.eup %859  ;;  %521 = vst [vmem:[%s1242_s20 + $0xc8] sm:$0xff] %v489_v2  ;;  %v395_v6 = vadd.f32 1.0, %v858_v3 }
  0x97   : > { %v862_v7 = vpop.eup %861  ;;  %867 = vrcp.f32 %v394_v4  ;;  %v396_v8 = vadd.f32 1.0, %v860_v5 }
  0x98   : > { %v864_v9 = vpop.eup %863  ;;  %869 = vrcp.f32 %v395_v6  ;;  %v397_v10 = vadd.f32 1.0, %v862_v7 }
  0x99   : > { %v866_v11 = vpop.eup %865  ;;  %871 = vrcp.f32 %v396_v8  ;;  %v398_v12 = vadd.f32 1.0, %v864_v9 }
  0x9a   : > { %873 = vrcp.f32 %v397_v10  ;;  %v399_v13 = vadd.f32 1.0, %v866_v11 }
  0x9b   : > { %875 = vrcp.f32 %v398_v12 }
  0x9c   : > { %877 = vrcp.f32 %v399_v13 }
  0xa1   : > { %v868_v16 = vpop.eup %867 }
  0xa2   : > { %v870_v18 = vpop.eup %869  ;;  %v490_v19 = vmul.f32 %v868_v16, %v234_v14 }
  0xa3   : > { %v872_v21 = vpop.eup %871  ;;  %v491_v22 = vmul.f32 %v870_v18, %v235_v15 }
  0xa4   : > { %v874_v24 = vpop.eup %873  ;;  %522 = vst [vmem:[%s1242_s20 + $0xd0] sm:$0xff] %v490_v19  ;;  %v492_v25 = vmul.f32 %v872_v21, %v236_v17 }
  0xa5   : > { %v876_v27 = vpop.eup %875  ;;  %523 = vst [vmem:[%s1242_s20 + $0xd8] sm:$0xff] %v491_v22  ;;  %v493_v28 = vmul.f32 %v874_v24, %v237_v20 }
  0xa6   : > { %v878_v29 = vpop.eup %877  ;;  %524 = vst [vmem:[%s1242_s20 + $0xe0] sm:$0xff] %v492_v25  ;;  %v494_v30 = vmul.f32 %v876_v27, %v238_v23 }
  0xa7   : > { %525 = vst [vmem:[%s1242_s20 + $0xe8] sm:$0xff] %v493_v28  ;;  %v495_v31 = vmul.f32 %v878_v29, %v239_v26 }
  0xa8   : > { %526 = vst [vmem:[%s1242_s20 + $0xf0] sm:$0xff] %v494_v30 }
  0xa9   : > { %527 = vst [vmem:[%s1242_s20 + $0xf8] sm:$0xff] %v495_v31 }
  0xaa   : > { %953 = shalt.err (!%p950_p11)
}
  0xab   : > { %s954_s14 = scalar_lea.hbm %s1317_s26, 4096  ;;  %s958_s4 = scalar_lea.hbm %s1367_s2, 16384 }
  0xac   : > { %p955_p3 = scmp.ne.s32.totalorder %s1317_s26, %s954_s14  ;;  %p959_p2 = scmp.lt.u32.totalorder %s1317_s26, %s1367_s2 }
  0xad   : > { %p960_p4 = scmp.lt.u32.totalorder %s958_s4, %s954_s14  ;;  %p962_p12 = scmp.lt.u32.totalorder %s954_s14, %s1317_s26 }
  0xae   : > { %p956_p8 = pnand %p955_p3, %p1378_p1 }
  0xaf   : > { %p961_p6 = por %p960_p4, %p959_p2 }
  0xb0   : > { %p957_p0 = pneg %p956_p8 }
  0xb1   : > { %p963_p13 = por %p962_p12, %p961_p6 }
  0xb3   : > { %p964_p9 = pnand %p963_p13, %p957_p0 }
  0xb5   : > { %967 = shalt.err (!%p964_p9)
}
  0xb6   : > { %s1018_s23 = smov 128   ;;  %s1019_s29 = smov 8  }
  0xb7   : > { %699 = dma.vmem_to_hbm [thread:$0]  (%p1378_p1), %s1319_s6, 4096, %s1317_s26, %s529_s13, %s1018_s23, %s1018_s23, %s1019_s29  }
  0xb8 PF: > { %p713_p5 = scmp.ge.s32.totalorder %s1010_s12, 2  ;;  %s557_s20 = sand.u32 1, %s998_s9  }
  0xb9   : > { %p1379_p7 = scmp.ne.s32.totalorder %s1373_s22, 0  ;;  %s558_s5 = scalar_lea.sflag [#allocation4], %s557_s20 }
  0xbb   : > { %p709_p10 = pnand %p713_p5, %p1379_p7 }
  0xbd   : > { %993 = dma.done.wait (!%p709_p10), %s558_s5, 4096  }
  0xbe   : > { %995 = vsyncadd (!%p709_p10), %s558_s5, 4294963200  ;;  %p18_p11 = scmp.ge.s32.totalorder %s1060_s15, 6   ;;  %s1380_s9 = smov %s1002_s10 }
  0xbf   : > { %s1381_s10 = smov %s1006_s11  ;;  %s1382_s11 = smov %s1072_s18 }
  0xc0   : > { %s1383_s12 = smov %s1060_s15  ;;  %20 = sbr.rel (!%p18_p11) target bundleno = 7 (0x7), region = 86 }
  0xc7   :  { %563 = vsyncpa [#allocation3], 1 }
  0xc8   :  { %565 = vsyncpa [#allocation3 + $0x1], 1 }
  0xc9   :  { %566 = vsyncpa [#allocation6], 1 }
  0xca   :  { %568 = vsyncpa [#allocation6 + $0x1], 1 }
  0xcb   :  { %569 = vsyncpa [#allocation4], 1 }
  0xcc   :  { %571 = vsyncpa [#allocation4 + $0x1], 1 }

</bundles_post_ra>
